<compile_context>
chip_gen: v6e
topology: v6e:2x2x1
jax: 0.10.0
libtpu: 0.0.40
codegen_flags: <defaults>
</compile_context>

<pallas_src>
import jax
import jax.numpy as jnp
from jax.experimental import pallas as pl
from jax.experimental.pallas import tpu as pltpu

GNN_LIST = ["gat", "gcn", "gin", "sage", "linear"]


def _round_up(a, b):
    return (a + b - 1) // b * b


def _mixed_op_kernel(adj_ref, xf_ref, xsc_ref, asrc_ref, cols_ref,
                     w_x_ref, w_gat_ref, w_gcn_ref, w_gin_ref, w_sgl_ref,
                     b_ref, o_ref):
    f32 = jnp.float32
    tm = o_ref.shape[0]
    row0 = pl.multiple_of(pl.program_id(0) * tm, 8)

    adj = adj_ref[...].astype(f32)            # [TM, Np] streamed (bf16 when exact)
    x_full = xf_ref[...]                      # [Np, Cin] resident
    x_tile = xf_ref[pl.ds(row0, tm), :]       # [TM, Cin] slice of resident x (no extra DMA)

    cols = cols_ref[...]                      # [TM, 6] host-precomputed per-row scalars
    d_i = cols[:, 0:1]                        # GCN d^-1/2
    gcn_sw = cols[:, 1:2]                     # GCN (w_ii + 1) * d^-1 folded self-loop coeff
    a_dst = cols[:, 2:3]                      # GAT dst logit
    e_self = cols[:, 3:4]                     # GAT self-loop logit (leaky already applied)
    s_bin = cols[:, 4:5]                      # 1.0 iff explicit self edge (GIN/SAGE)
    inv_deg = cols[:, 5:6]                    # SAGE 1 / max(deg, 1)

    # ---------------- GCN (aggregate-then-project; self loop folded into gcn_sw)
    agg_gcn = d_i * jnp.dot(adj, xsc_ref[...], preferred_element_type=f32) + gcn_sw * x_tile

    # ---------------- shared binary aggregation (GIN sum / SAGE mean)
    has_edge = adj > 0.0                      # adj no longer needed after this point
    adj_bin = has_edge.astype(f32)
    agg_bin = jnp.dot(adj_bin, x_full, preferred_element_type=f32) + s_bin * x_tile
    mean_nb = agg_bin * inv_deg
    # TODO(synk): the GAT and GIN aggregations share RHS x_full; a sublane-concat
    # [p ; adj_bin] single dot would halve MXU RHS loads (skipped: adds two [TM,N]
    # VMEM copy passes and concat-lowering risk for a non-MXU-bound kernel).

    # ---------------- GAT (1 head, concat=False, self loop handled algebraically)
    e = a_dst + asrc_ref[...]                 # [TM,1] + [1,Np] -> [TM, Np]
    e = jnp.where(e >= 0.0, e, 0.2 * e)       # leaky relu (slope 0.2)
    e = jnp.where(has_edge, e, -1e30)
    m = jnp.maximum(jnp.max(e, axis=-1, keepdims=True), e_self)
    p = jnp.exp(e - m)                        # masked lanes -> exp(-huge) = 0
    p_self = jnp.exp(e_self - m)
    inv_den = 1.0 / (jnp.sum(p, axis=-1, keepdims=True) + p_self)   # [TM,1], exact (cheap)
    agg_gat = (jnp.dot(p, x_full, preferred_element_type=f32)
               + p_self * x_tile) * inv_den   # normalization folded after the MXU dot

    # ---------------- arch-weighted mixture: arch weights & biases folded into the
    # (lane-padded) projection weights on the host -> five narrow projections + bias.
    # TODO(synk): fuse the five projections into one K=5*Cin matmul when Cin % 128 == 0.
    out = jnp.dot(x_tile, w_x_ref[...], preferred_element_type=f32)      # GIN/SAGE/Linear roots
    out += jnp.dot(agg_gat, w_gat_ref[...], preferred_element_type=f32)  # w0 * GAT
    out += jnp.dot(agg_gcn, w_gcn_ref[...], preferred_element_type=f32)  # w1 * GCN
    out += jnp.dot(agg_bin, w_gin_ref[...], preferred_element_type=f32)  # w2 * GIN (neighbors)
    out += jnp.dot(mean_nb, w_sgl_ref[...], preferred_element_type=f32)  # w3 * SAGE (neighbors)
    o_ref[...] = out + b_ref[...]


def mixed_op_pallas(x, edge_index, edge_weight, arch_weights, params, *, tm=128):
    """selected_idx=None branch of MixedOp.forward."""
    f32 = jnp.float32
    n, in_c = x.shape
    out_c = params["w_lin"].shape[1]
    x = x.astype(f32)
    aw = arch_weights.astype(f32)

    p_out = _round_up(out_c, 128)             # lane-dense output stores
    # Stream the adjacency in bf16 only when it is exactly representable
    # (edge_weight=None -> entries are small integer edge multiplicities); arbitrary
    # edge weights keep f32 so results stay within the 1e-3 tolerance.
    adj_dtype = jnp.bfloat16 if edge_weight is None else f32
    adj_bytes = 2 if edge_weight is None else 4

    # --- VMEM budget, re-derived per generation (v7x has only 64 MiB / TC) ---
    try:
        vmem_cap = int(pltpu.get_tpu_info().vmem_capacity_bytes)
    except Exception:                          # query unavailable -> assume smallest part
        vmem_cap = 64 * 1024 * 1024
    vmem_limit = max(32 * 1024 * 1024,
                     min(100 * 1024 * 1024, vmem_cap - 8 * 1024 * 1024))

    tm = max(8, min(int(tm), _round_up(n, 8)))
    tm = _round_up(tm, 8)

    def _vmem_estimate(tm_):
        n_pad_ = _round_up(n, tm_)
        resident = (2 * n_pad_ * in_c + n_pad_) * 4 + (5 * in_c + 1) * p_out * 4
        per_tile = (2 * tm_ * n_pad_ * adj_bytes        # double-buffered adj stream
                    + 2 * tm_ * (p_out + 6) * 4         # output + scalar-column buffers
                    + 4 * tm_ * n_pad_ * 4)             # live f32 [TM,N] temps (adj/e/p/mask)
        return 2 * resident + per_tile                  # residents are double-buffered too

    while tm > 8 and _vmem_estimate(tm) > vmem_limit:
        tm -= 8                                         # shrink the row tile until it fits
    n_pad = _round_up(n, tm)
    # TODO(synk): for very large graphs (N_pad >~ 8-16K) add a second "arbitrary" grid
    # axis tiling the N (contraction) dimension with an online-softmax GAT accumulator
    # instead of keeping x_full resident and adj rows full-width.

    # --- graph glue (dense O(N^2) densification on the host; this, not the kernel,
    #     is the real scalability ceiling) ---
    src, dst = edge_index[0], edge_index[1]
    ew = jnp.ones(src.shape, f32) if edge_weight is None else edge_weight.astype(f32)
    adj_full = jnp.zeros((n_pad, n_pad), f32).at[dst, src].add(ew)   # adj[target, source]
    idx = jnp.arange(n_pad)
    adj_diag = adj_full[idx, idx][:, None]                           # explicit self-edge weight
    adj = adj_full.at[idx, idx].set(0.0)                             # diag handled algebraically
    x_pad = jnp.zeros((n_pad, in_c), f32).at[:n, :].set(x)

    # --- grid-invariant per-node quantities, hoisted out of the kernel ---
    deg_gcn = jnp.sum(adj_full, axis=1, keepdims=True) + 1.0         # sym-norm degree (+ self loop)
    d_inv_sqrt = jax.lax.rsqrt(deg_gcn)                              # [n_pad, 1]
    x_sc = d_inv_sqrt * x_pad                                        # GCN-scaled features
    gcn_sw = (adj_diag + 1.0) * d_inv_sqrt * d_inv_sqrt              # GCN self-loop coefficient

    deg_bin = jnp.sum((adj_full > 0.0).astype(f32), axis=1, keepdims=True)
    inv_deg = 1.0 / jnp.maximum(deg_bin, 1.0)                        # SAGE mean normalization
    s_bin = (adj_diag > 0.0).astype(f32)                             # explicit self edge flag

    h_gat = x_pad @ params["w_gat"].astype(f32)                      # [n_pad, out_c]
    att = params["att"].astype(f32)
    alpha_src = h_gat @ att[0:1, :].T                                # [n_pad, 1]
    alpha_dst = h_gat @ att[1:2, :].T
    e_self = alpha_dst + alpha_src
    e_self = jnp.where(e_self >= 0.0, e_self, 0.2 * e_self)          # self-loop logit (leaky)
    asrc_row = jnp.transpose(alpha_src)                              # [1, n_pad]

    tilecols = jnp.concatenate(
        [d_inv_sqrt, gcn_sw, alpha_dst, e_self, s_bin, inv_deg], axis=1)   # [n_pad, 6]

    # --- fold arch weights + biases into the (lane-padded) projection weights ---
    w0, w1, w2, w3, w4 = aw[0], aw[1], aw[2], aw[3], aw[4]

    def padw(w):
        return jnp.zeros((in_c, p_out), f32).at[:, :out_c].set(w.astype(f32))

    w_x = padw(w2 * params["w_gin"] + w3 * params["w_sage_r"] + w4 * params["w_lin"])
    w_gat_s = padw(w0 * params["w_gat"])
    w_gcn_s = padw(w1 * params["w_gcn"])
    w_gin_s = padw(w2 * params["w_gin"])
    w_sgl_s = padw(w3 * params["w_sage_l"])
    b_mix = (w0 * params["b_gat"] + w1 * params["b_gcn"] + w2 * params["b_gin"]
             + w3 * params["b_sage"] + w4 * params["b_lin"]).astype(f32)     # [1, out_c]
    b_pad = jnp.zeros((1, p_out), f32).at[:, :out_c].set(b_mix)

    # TODO(synk): mark the index-invariant inputs with pipeline_mode=pl.Buffered(1)
    # (halves their double-buffered VMEM); skipped here to avoid compile risk on
    # older jax releases.
    grid = (n_pad // tm,)
    in_specs = [
        pl.BlockSpec((tm, n_pad), lambda i: (i, 0)),      # adj row-tile (streamed bf16/f32)
        pl.BlockSpec((n_pad, in_c), lambda i: (0, 0)),    # x (resident)
        pl.BlockSpec((n_pad, in_c), lambda i: (0, 0)),    # d^-1/2 * x (resident)
        pl.BlockSpec((1, n_pad), lambda i: (0, 0)),       # GAT alpha_src row (resident)
        pl.BlockSpec((tm, 6), lambda i: (i, 0)),          # per-row scalar columns (tile)
        pl.BlockSpec((in_c, p_out), lambda i: (0, 0)),    # w_x (GIN/SAGE/Linear roots)
        pl.BlockSpec((in_c, p_out), lambda i: (0, 0)),    # w0*W_gat
        pl.BlockSpec((in_c, p_out), lambda i: (0, 0)),    # w1*W_gcn
        pl.BlockSpec((in_c, p_out), lambda i: (0, 0)),    # w2*W_gin
        pl.BlockSpec((in_c, p_out), lambda i: (0, 0)),    # w3*W_sage_l
        pl.BlockSpec((1, p_out), lambda i: (0, 0)),       # mixed bias
    ]
    out_spec = pl.BlockSpec((tm, p_out), lambda i: (i, 0))

    out_pad = pl.pallas_call(
        _mixed_op_kernel,
        out_shape=jax.ShapeDtypeStruct((n_pad, p_out), f32),
        grid_spec=pltpu.PrefetchScalarGridSpec(
            num_scalar_prefetch=0,
            grid=grid,
            in_specs=in_specs,
            out_specs=out_spec),
        compiler_params=pltpu.CompilerParams(
            dimension_semantics=("parallel",),            # rows independent -> megacore split
            vmem_limit_bytes=vmem_limit),
    )(adj.astype(adj_dtype), x_pad, x_sc, asrc_row, tilecols,
      w_x, w_gat_s, w_gcn_s, w_gin_s, w_sgl_s, b_pad)
    return out_pad[:n, :out_c]


def mixed_op_reference(x, edge_index, edge_weight, arch_weights, params):
    """Pure-JAX reference with the original per-branch math (for validation)."""
    n = x.shape[0]
    src, dst = edge_index[0], edge_index[1]
    ew = jnp.ones(src.shape, jnp.float32) if edge_weight is None else edge_weight
    adj_w = jnp.zeros((n, n), jnp.float32).at[dst, src].add(ew)
    eye = jnp.eye(n, dtype=jnp.float32)
    adj_bin = (adj_w > 0.0).astype(jnp.float32)

    h = x @ params["w_gat"]
    a_s = jnp.sum(h * params["att"][0:1], -1, keepdims=True)
    a_d = jnp.sum(h * params["att"][1:2], -1, keepdims=True)
    e = a_d + a_s.T
    e = jnp.where(e >= 0, e, 0.2 * e)
    mask = jnp.minimum(adj_bin + eye, 1.0)
    e = jnp.where(mask > 0, e, -1e30)
    p = jnp.exp(e - e.max(-1, keepdims=True)) * mask
    out_gat = (p / p.sum(-1, keepdims=True)) @ h + params["b_gat"]

    a_gcn = adj_w + eye
    dis = jax.lax.rsqrt(a_gcn.sum(-1, keepdims=True))
    out_gcn = dis * (a_gcn @ (dis * (x @ params["w_gcn"]))) + params["b_gcn"]

    out_gin = (x + adj_bin @ x) @ params["w_gin"] + params["b_gin"]

    deg = adj_bin.sum(-1, keepdims=True)
    mean_nb = (adj_bin @ x) / jnp.maximum(deg, 1.0)
    out_sage = mean_nb @ params["w_sage_l"] + params["b_sage"] + x @ params["w_sage_r"]

    out_lin = x @ params["w_lin"] + params["b_lin"]

    w = arch_weights
    return (w[0] * out_gat + w[1] * out_gcn + w[2] * out_gin
            + w[3] * out_sage + w[4] * out_lin)


def init_params(key, in_c, out_c):
    ks = jax.random.split(key, 12)
    g = lambda k, s: 0.1 * jax.random.normal(k, s, jnp.float32)
    return {
        "w_gat":    g(ks[0], (in_c, out_c)),
        "att":      g(ks[1], (2, out_c)),        # [a_src; a_dst]
        "b_gat":    g(ks[2], (1, out_c)),
        "w_gcn":    g(ks[3], (in_c, out_c)),
        "b_gcn":    g(ks[4], (1, out_c)),
        "w_gin":    g(ks[5], (in_c, out_c)),
        "b_gin":    g(ks[6], (1, out_c)),
        "w_sage_l": g(ks[7], (in_c, out_c)),
        "w_sage_r": g(ks[8], (in_c, out_c)),
        "b_sage":   g(ks[9], (1, out_c)),
        "w_lin":    g(ks[10], (in_c, out_c)),
        "b_lin":    g(ks[11], (1, out_c)),
    }


def _run_case(key, n, in_c, out_c, n_edges, tm):
    k_x, k_e, k_w, k_p = jax.random.split(key, 4)
    x = jax.random.normal(k_x, (n, in_c), jnp.float32)
    edge_index = jax.random.randint(k_e, (2, n_edges), 0, n, jnp.int32)
    edge_weight = None   # matches the `edge_weight == None` branch of forward
    arch_weights = jax.nn.softmax(jax.random.normal(k_w, (len(GNN_LIST),), jnp.float32))
    params = init_params(k_p, in_c, out_c)

    out = mixed_op_pallas(x, edge_index, edge_weight, arch_weights, params, tm=tm)
    out = jax.block_until_ready(out)
    ref = mixed_op_reference(x, edge_index, edge_weight, arch_weights, params)
    assert out.shape == (n, out_c)
    assert jnp.allclose(out, ref, atol=1e-3, rtol=1e-3), "mismatch vs reference"


if __name__ == "__main__":
    key = jax.random.PRNGKey(0)
    k1, k2 = jax.random.split(key)
    # multi-tile grid (N=16, TM=8 -> 2 grid steps, even split for v7x's 2 TCs)
    _run_case(k1, n=16, in_c=8, out_c=16, n_edges=40, tm=8)
    # row padding path (N=20 -> padded to 24) + multi-tile
    _run_case(k2, n=20, in_c=8, out_c=16, n_edges=48, tm=8)

    # TODO(synk): the `selected_idx is not None` branch just dispatches a single
    # sub-op; it is covered by setting the other architecture weights to zero.
    print("KERNEL_OK")
</pallas_src>

<mosaic_0001>
module attributes {stable_mosaic.version = 11 : i64} {
  func.func @_mixed_op_kernel(%arg0: i32, %arg1: memref<8x16xbf16, #tpu.memory_space<vmem>>, %arg2: memref<16x8xf32, #tpu.memory_space<vmem>>, %arg3: memref<16x8xf32, #tpu.memory_space<vmem>>, %arg4: memref<1x16xf32, #tpu.memory_space<vmem>>, %arg5: memref<8x6xf32, #tpu.memory_space<vmem>>, %arg6: memref<8x128xf32, #tpu.memory_space<vmem>>, %arg7: memref<8x128xf32, #tpu.memory_space<vmem>>, %arg8: memref<8x128xf32, #tpu.memory_space<vmem>>, %arg9: memref<8x128xf32, #tpu.memory_space<vmem>>, %arg10: memref<8x128xf32, #tpu.memory_space<vmem>>, %arg11: memref<1x128xf32, #tpu.memory_space<vmem>>, %arg12: memref<8x128xf32, #tpu.memory_space<vmem>>) attributes {dimension_semantics = [#tpu.dimension_semantics<parallel>], iteration_bounds = array<i64: 2>, scalar_prefetch = 0 : i64, scratch_operands = 0 : i64, tpu.core_type = #tpu.core_type<tc>, window_params = [{transform_indices = @transform_0, window_bounds = array<i64: 8, 16>}, {pipeline_mode = #tpu.pipeline_mode<synchronous>, transform_indices = @transform_1, window_bounds = array<i64: 16, 8>}, {pipeline_mode = #tpu.pipeline_mode<synchronous>, transform_indices = @transform_2, window_bounds = array<i64: 16, 8>}, {pipeline_mode = #tpu.pipeline_mode<synchronous>, transform_indices = @transform_3, window_bounds = array<i64: 1, 16>}, {transform_indices = @transform_4, window_bounds = array<i64: 8, 6>}, {pipeline_mode = #tpu.pipeline_mode<synchronous>, transform_indices = @transform_5, window_bounds = array<i64: 8, 128>}, {pipeline_mode = #tpu.pipeline_mode<synchronous>, transform_indices = @transform_6, window_bounds = array<i64: 8, 128>}, {pipeline_mode = #tpu.pipeline_mode<synchronous>, transform_indices = @transform_7, window_bounds = array<i64: 8, 128>}, {pipeline_mode = #tpu.pipeline_mode<synchronous>, transform_indices = @transform_8, window_bounds = array<i64: 8, 128>}, {pipeline_mode = #tpu.pipeline_mode<synchronous>, transform_indices = @transform_9, window_bounds = array<i64: 8, 128>}, {pipeline_mode = #tpu.pipeline_mode<synchronous>, transform_indices = @transform_10, window_bounds = array<i64: 1, 128>}, {transform_indices = @transform_11, window_bounds = array<i64: 8, 128>}]} {
    %c8_i32 = arith.constant 8 : i32
    %0 = arith.muli %arg0, %c8_i32 : i32
    %1 = tpu.assume_multiple %0, 8 : i32
    %c0 = arith.constant 0 : index
    %c0_0 = arith.constant 0 : index
    %2 = vector.load %arg1[%c0, %c0_0] : memref<8x16xbf16, #tpu.memory_space<vmem>>, vector<8x16xbf16>
    %3 = arith.extf %2 : vector<8x16xbf16> to vector<8x16xf32>
    %c0_1 = arith.constant 0 : index
    %c0_2 = arith.constant 0 : index
    %4 = vector.load %arg2[%c0_1, %c0_2] : memref<16x8xf32, #tpu.memory_space<vmem>>, vector<16x8xf32>
    %5 = arith.index_cast %1 : i32 to index
    %c0_3 = arith.constant 0 : index
    %6 = vector.load %arg2[%5, %c0_3] : memref<16x8xf32, #tpu.memory_space<vmem>>, vector<8x8xf32>
    %c0_4 = arith.constant 0 : index
    %c0_5 = arith.constant 0 : index
    %7 = vector.load %arg5[%c0_4, %c0_5] : memref<8x6xf32, #tpu.memory_space<vmem>>, vector<8x6xf32>
    %8 = vector.extract_strided_slice %7 {offsets = [0, 0], sizes = [8, 1], strides = [1, 1]} : vector<8x6xf32> to vector<8x1xf32>
    %9 = vector.extract_strided_slice %7 {offsets = [0, 1], sizes = [8, 1], strides = [1, 1]} : vector<8x6xf32> to vector<8x1xf32>
    %10 = vector.extract_strided_slice %7 {offsets = [0, 2], sizes = [8, 1], strides = [1, 1]} : vector<8x6xf32> to vector<8x1xf32>
    %11 = vector.extract_strided_slice %7 {offsets = [0, 3], sizes = [8, 1], strides = [1, 1]} : vector<8x6xf32> to vector<8x1xf32>
    %12 = vector.extract_strided_slice %7 {offsets = [0, 4], sizes = [8, 1], strides = [1, 1]} : vector<8x6xf32> to vector<8x1xf32>
    %13 = vector.extract_strided_slice %7 {offsets = [0, 5], sizes = [8, 1], strides = [1, 1]} : vector<8x6xf32> to vector<8x1xf32>
    %c0_6 = arith.constant 0 : index
    %c0_7 = arith.constant 0 : index
    %14 = vector.load %arg3[%c0_6, %c0_7] : memref<16x8xf32, #tpu.memory_space<vmem>>, vector<16x8xf32>
    %cst = arith.constant dense<0.000000e+00> : vector<8x8xf32>
    %15 = tpu.matmul %3, %14, %cst {dimension_numbers = #tpu.dot_dimension_numbers<[1], [0], [0], [1], [0, 0, 1, 1], [], []>} : vector<8x16xf32>, vector<16x8xf32>, vector<8x8xf32> -> vector<8x8xf32>
    %16 = vector.broadcast %8 : vector<8x1xf32> to vector<8x8xf32>
    %17 = arith.mulf %16, %15 : vector<8x8xf32>
    %18 = vector.broadcast %9 : vector<8x1xf32> to vector<8x8xf32>
    %19 = arith.mulf %18, %6 : vector<8x8xf32>
    %20 = arith.addf %17, %19 : vector<8x8xf32>
    %cst_8 = arith.constant 0.000000e+00 : f32
    %21 = vector.broadcast %cst_8 : f32 to vector<8x16xf32>
    %22 = arith.cmpf ogt, %3, %21 : vector<8x16xf32>
    %23 = arith.extui %22 : vector<8x16xi1> to vector<8x16xi32>
    %24 = arith.sitofp %23 : vector<8x16xi32> to vector<8x16xf32>
    %cst_9 = arith.constant dense<0.000000e+00> : vector<8x8xf32>
    %25 = tpu.matmul %24, %4, %cst_9 {dimension_numbers = #tpu.dot_dimension_numbers<[1], [0], [0], [1], [0, 0, 1, 1], [], []>} : vector<8x16xf32>, vector<16x8xf32>, vector<8x8xf32> -> vector<8x8xf32>
    %26 = vector.broadcast %12 : vector<8x1xf32> to vector<8x8xf32>
    %27 = arith.mulf %26, %6 : vector<8x8xf32>
    %28 = arith.addf %25, %27 : vector<8x8xf32>
    %29 = vector.broadcast %13 : vector<8x1xf32> to vector<8x8xf32>
    %30 = arith.mulf %28, %29 : vector<8x8xf32>
    %c0_10 = arith.constant 0 : index
    %c0_11 = arith.constant 0 : index
    %31 = vector.load %arg4[%c0_10, %c0_11] : memref<1x16xf32, #tpu.memory_space<vmem>>, vector<1x16xf32>
    %32 = vector.broadcast %10 : vector<8x1xf32> to vector<8x16xf32>
    %33 = vector.broadcast %31 : vector<1x16xf32> to vector<8x16xf32>
    %34 = arith.addf %32, %33 : vector<8x16xf32>
    %cst_12 = arith.constant 0.000000e+00 : f32
    %35 = vector.broadcast %cst_12 : f32 to vector<8x16xf32>
    %36 = arith.cmpf oge, %34, %35 : vector<8x16xf32>
    %cst_13 = arith.constant 2.000000e-01 : f32
    %37 = vector.broadcast %cst_13 : f32 to vector<8x16xf32>
    %38 = arith.mulf %37, %34 : vector<8x16xf32>
    %39 = arith.select %36, %34, %38 : vector<8x16xi1>, vector<8x16xf32>
    %cst_14 = arith.constant -1.000000e+30 : f32
    %40 = vector.broadcast %cst_14 : f32 to vector<8x16xf32>
    %41 = arith.select %22, %39, %40 : vector<8x16xi1>, vector<8x16xf32>
    %cst_15 = arith.constant dense<0xFF800000> : vector<8xf32>
    %42 = vector.multi_reduction <maximumf>, %41, %cst_15 [1] : vector<8x16xf32> to vector<8xf32>
    %43 = vector.shape_cast %42 : vector<8xf32> to vector<8x1xf32>
    %44 = arith.maximumf %43, %11 : vector<8x1xf32>
    %45 = vector.broadcast %44 : vector<8x1xf32> to vector<8x16xf32>
    %46 = arith.subf %41, %45 : vector<8x16xf32>
    %47 = math.exp %46 : vector<8x16xf32>
    %48 = arith.subf %11, %44 : vector<8x1xf32>
    %49 = math.exp %48 : vector<8x1xf32>
    %cst_16 = arith.constant dense<0.000000e+00> : vector<8xf32>
    %50 = vector.multi_reduction <add>, %47, %cst_16 [1] : vector<8x16xf32> to vector<8xf32>
    %51 = vector.shape_cast %50 : vector<8xf32> to vector<8x1xf32>
    %52 = arith.addf %51, %49 : vector<8x1xf32>
    %cst_17 = arith.constant 1.000000e+00 : f32
    %53 = vector.broadcast %cst_17 : f32 to vector<8x1xf32>
    %54 = arith.divf %53, %52 : vector<8x1xf32>
    %cst_18 = arith.constant dense<0.000000e+00> : vector<8x8xf32>
    %55 = tpu.matmul %47, %4, %cst_18 {dimension_numbers = #tpu.dot_dimension_numbers<[1], [0], [0], [1], [0, 0, 1, 1], [], []>} : vector<8x16xf32>, vector<16x8xf32>, vector<8x8xf32> -> vector<8x8xf32>
    %56 = vector.broadcast %49 : vector<8x1xf32> to vector<8x8xf32>
    %57 = arith.mulf %56, %6 : vector<8x8xf32>
    %58 = arith.addf %55, %57 : vector<8x8xf32>
    %59 = vector.broadcast %54 : vector<8x1xf32> to vector<8x8xf32>
    %60 = arith.mulf %58, %59 : vector<8x8xf32>
    %c0_19 = arith.constant 0 : index
    %c0_20 = arith.constant 0 : index
    %61 = vector.load %arg6[%c0_19, %c0_20] : memref<8x128xf32, #tpu.memory_space<vmem>>, vector<8x128xf32>
    %cst_21 = arith.constant dense<0.000000e+00> : vector<8x128xf32>
    %62 = tpu.matmul %6, %61, %cst_21 {dimension_numbers = #tpu.dot_dimension_numbers<[1], [0], [0], [1], [0, 0, 1, 1], [], []>} : vector<8x8xf32>, vector<8x128xf32>, vector<8x128xf32> -> vector<8x128xf32>
    %c0_22 = arith.constant 0 : index
    %c0_23 = arith.constant 0 : index
    %63 = vector.load %arg7[%c0_22, %c0_23] : memref<8x128xf32, #tpu.memory_space<vmem>>, vector<8x128xf32>
    %cst_24 = arith.constant dense<0.000000e+00> : vector<8x128xf32>
    %64 = tpu.matmul %60, %63, %cst_24 {dimension_numbers = #tpu.dot_dimension_numbers<[1], [0], [0], [1], [0, 0, 1, 1], [], []>} : vector<8x8xf32>, vector<8x128xf32>, vector<8x128xf32> -> vector<8x128xf32>
    %65 = arith.addf %62, %64 : vector<8x128xf32>
    %c0_25 = arith.constant 0 : index
    %c0_26 = arith.constant 0 : index
    %66 = vector.load %arg8[%c0_25, %c0_26] : memref<8x128xf32, #tpu.memory_space<vmem>>, vector<8x128xf32>
    %cst_27 = arith.constant dense<0.000000e+00> : vector<8x128xf32>
    %67 = tpu.matmul %20, %66, %cst_27 {dimension_numbers = #tpu.dot_dimension_numbers<[1], [0], [0], [1], [0, 0, 1, 1], [], []>} : vector<8x8xf32>, vector<8x128xf32>, vector<8x128xf32> -> vector<8x128xf32>
    %68 = arith.addf %65, %67 : vector<8x128xf32>
    %c0_28 = arith.constant 0 : index
    %c0_29 = arith.constant 0 : index
    %69 = vector.load %arg9[%c0_28, %c0_29] : memref<8x128xf32, #tpu.memory_space<vmem>>, vector<8x128xf32>
    %cst_30 = arith.constant dense<0.000000e+00> : vector<8x128xf32>
    %70 = tpu.matmul %28, %69, %cst_30 {dimension_numbers = #tpu.dot_dimension_numbers<[1], [0], [0], [1], [0, 0, 1, 1], [], []>} : vector<8x8xf32>, vector<8x128xf32>, vector<8x128xf32> -> vector<8x128xf32>
    %71 = arith.addf %68, %70 : vector<8x128xf32>
    %c0_31 = arith.constant 0 : index
    %c0_32 = arith.constant 0 : index
    %72 = vector.load %arg10[%c0_31, %c0_32] : memref<8x128xf32, #tpu.memory_space<vmem>>, vector<8x128xf32>
    %cst_33 = arith.constant dense<0.000000e+00> : vector<8x128xf32>
    %73 = tpu.matmul %30, %72, %cst_33 {dimension_numbers = #tpu.dot_dimension_numbers<[1], [0], [0], [1], [0, 0, 1, 1], [], []>} : vector<8x8xf32>, vector<8x128xf32>, vector<8x128xf32> -> vector<8x128xf32>
    %74 = arith.addf %71, %73 : vector<8x128xf32>
    %c0_34 = arith.constant 0 : index
    %c0_35 = arith.constant 0 : index
    %75 = vector.load %arg11[%c0_34, %c0_35] : memref<1x128xf32, #tpu.memory_space<vmem>>, vector<1x128xf32>
    %76 = vector.broadcast %75 : vector<1x128xf32> to vector<8x128xf32>
    %77 = arith.addf %74, %76 : vector<8x128xf32>
    %c0_36 = arith.constant 0 : index
    %c0_37 = arith.constant 0 : index
    %78 = vector.load %arg12[%c0_36, %c0_37] : memref<8x128xf32, #tpu.memory_space<vmem>>, vector<8x128xf32>
    tpu.vector_store %arg12[%c0_36, %c0_37], %77 {strides = array<i32>} : memref<8x128xf32, #tpu.memory_space<vmem>>, vector<8x128xf32>,
    return
  }
  func.func @transform_0(%arg0: i32) -> (i32, i32) {
    %c0_i32 = arith.constant 0 : i32
    %c0_i32_0 = arith.constant 0 : i32
    return %arg0, %c0_i32 : i32, i32
  }
  func.func @transform_1(%arg0: i32) -> (i32, i32) {
    %c0_i32 = arith.constant 0 : i32
    %c0_i32_0 = arith.constant 0 : i32
    %c0_i32_1 = arith.constant 0 : i32
    return %c0_i32, %c0_i32_0 : i32, i32
  }
  func.func @transform_2(%arg0: i32) -> (i32, i32) {
    %c0_i32 = arith.constant 0 : i32
    %c0_i32_0 = arith.constant 0 : i32
    %c0_i32_1 = arith.constant 0 : i32
    return %c0_i32, %c0_i32_0 : i32, i32
  }
  func.func @transform_3(%arg0: i32) -> (i32, i32) {
    %c0_i32 = arith.constant 0 : i32
    %c0_i32_0 = arith.constant 0 : i32
    %c0_i32_1 = arith.constant 0 : i32
    return %c0_i32, %c0_i32_0 : i32, i32
  }
  func.func @transform_4(%arg0: i32) -> (i32, i32) {
    %c0_i32 = arith.constant 0 : i32
    %c0_i32_0 = arith.constant 0 : i32
    return %arg0, %c0_i32 : i32, i32
  }
  func.func @transform_5(%arg0: i32) -> (i32, i32) {
    %c0_i32 = arith.constant 0 : i32
    %c0_i32_0 = arith.constant 0 : i32
    %c0_i32_1 = arith.constant 0 : i32
    return %c0_i32, %c0_i32_0 : i32, i32
  }
  func.func @transform_6(%arg0: i32) -> (i32, i32) {
    %c0_i32 = arith.constant 0 : i32
    %c0_i32_0 = arith.constant 0 : i32
    %c0_i32_1 = arith.constant 0 : i32
    return %c0_i32, %c0_i32_0 : i32, i32
  }
  func.func @transform_7(%arg0: i32) -> (i32, i32) {
    %c0_i32 = arith.constant 0 : i32
    %c0_i32_0 = arith.constant 0 : i32
    %c0_i32_1 = arith.constant 0 : i32
    return %c0_i32, %c0_i32_0 : i32, i32
  }
  func.func @transform_8(%arg0: i32) -> (i32, i32) {
    %c0_i32 = arith.constant 0 : i32
    %c0_i32_0 = arith.constant 0 : i32
    %c0_i32_1 = arith.constant 0 : i32
    return %c0_i32, %c0_i32_0 : i32, i32
  }
  func.func @transform_9(%arg0: i32) -> (i32, i32) {
    %c0_i32 = arith.constant 0 : i32
    %c0_i32_0 = arith.constant 0 : i32
    %c0_i32_1 = arith.constant 0 : i32
    return %c0_i32, %c0_i32_0 : i32, i32
  }
  func.func @transform_10(%arg0: i32) -> (i32, i32) {
    %c0_i32 = arith.constant 0 : i32
    %c0_i32_0 = arith.constant 0 : i32
    %c0_i32_1 = arith.constant 0 : i32
    return %c0_i32, %c0_i32_0 : i32, i32
  }
  func.func @transform_11(%arg0: i32) -> (i32, i32) {
    %c0_i32 = arith.constant 0 : i32
    %c0_i32_0 = arith.constant 0 : i32
    return %arg0, %c0_i32 : i32, i32
  }
}

</mosaic_0001>

<bundles_post_ra>
// kernel: tpu_custom_call.1
= control target key start
LH: loop header
LB: loop body
LE: loop exit
PB: predicated region body
PF: predicated region fallthrough
CT: control target
= control target key end

     0   :  { %s1635_s0 = inlined_call_operand.vmem [shape: bf16[16,16], index: 0, kind: input, shape index: {}]   ;;  %s1636_s1 = inlined_call_operand.vmem [shape: f32[16,8], index: 1, kind: input, shape index: {}]   ;;  %s1637_s2 = inlined_call_operand.vmem [shape: f32[16,8], index: 2, kind: input, shape index: {}]   ;;  %s1638_s3 = inlined_call_operand.vmem [shape: f32[1,16], index: 3, kind: input, shape index: {}]   ;;  %s1639_s4 = inlined_call_operand.vmem [shape: f32[16,6], index: 4, kind: input, shape index: {}]   ;;  %s1640_s5 = inlined_call_operand.vmem [shape: f32[8,128], index: 5, kind: input, shape index: {}]   ;;  %s1641_s6 = inlined_call_operand.vmem [shape: f32[8,128], index: 6, kind: input, shape index: {}]   ;;  %s1642_s7 = inlined_call_operand.vmem [shape: f32[8,128], index: 7, kind: input, shape index: {}]   ;;  %s1643_s8 = inlined_call_operand.vmem [shape: f32[8,128], index: 8, kind: input, shape index: {}]   ;;  %s1644_s9 = inlined_call_operand.vmem [shape: f32[8,128], index: 9, kind: input, shape index: {}]   ;;  %s1645_s10 = inlined_call_operand.vmem [shape: f32[1,128], index: 10, kind: input, shape index: {}]   ;;  %s1646_s11 = inlined_call_operand.hbm [shape: f32[16,128], index: 11, kind: output, shape index: {}]  }
   0x1   :  { %1647 = sst [smem:[#allocation6_spill]] %s1635_s0 }
   0x2   :  { %16 = vsyncpa [#allocation3], 0 }
   0x3   :  { %18 = vsyncpa [#allocation3 + $0x1], 0  ;;  %s1453_s17 = smov 0   ;;  %s1455_s18 = smov 0  }
   0x4   :  { %s1457_s19 = smov 0   ;;  %s1459_s20 = smov 0  }
   0x5 LB: > { %s1474_s21 = sadd.s32 4294967295, %s1382_s20   ;;  %s1173_s22 = sadd.s32 4294967294, %s1382_s20   ;;  %s1382_s20 = sphi %s1459_s20, %s1658_s20   ;;  %s1378_s19 = sphi %s1457_s19, %s1657_s19   ;;  %s1374_s18 = sphi %s1455_s18, %s1656_s18   ;;  %s1370_s17 = sphi %s1453_s17, %s1655_s17  }
   0x6   : > { %s1478_s23 = sadd.s32 1, %s1382_s20   ;;  %s272_s24 = sadd.s32 1, %s1378_s19 }
   0x7   : > { %s269_s25 = ssub.s32 %s1382_s20, %s1478_s23  ;;  %p282_p0 = scmp.ne.s32.totalorder %s1378_s19, %s1374_s18 }
   0x8   : > { %p270_p1 = scmp.eq.s32.totalorder %s269_s25, 0  ;;  %p283_p2 = scmp.eq.s32.totalorder %s1474_s21, 1 }
   0x9   : > { %p288_p3 = scmp.ne.s32.totalorder %s1374_s18, %s1370_s17  ;;  %p289_p4 = scmp.eq.s32.totalorder %s1173_s22, 1 }
   0xa   : > { %s1489_s26 = scalar_select %p270_p1, %s1378_s19, %s272_s24  }
   0xb   : > { %p1491_p5 = por %p283_p2, %p282_p0  ;;  %p1495_p6 = por %p289_p4, %p288_p3 }
   0xc   : > { %1648 = sst [smem:[#allocation5_spill]] %s1489_s26  ;;  %p1176_p7 = scmp.ge.s32.totalorder %s1382_s20, 1 }
   0xd   : > { %p348_p8 = scmp.lt.s32.totalorder %s1382_s20, 3 }
   0xf   : > { %p349_p9 = pnand %p1176_p7, %p348_p8 }
  0x10   : > { %p391_p10 = scmp.lt.s32.totalorder (!%p349_p9), %s1474_s21, 1  ;;  %s1651_s0 = sld [smem:[#allocation6_spill]] (!%p349_p9) }
  0x11   : > { %352 = sbr.rel (%p349_p9) target bundleno = 941 (0x3ad), region = 64  ;;  %s1180_s22 = sshll.u32 (!%p349_p9), %s1474_s21, 3 }
  0x12   : > { %s404_s26 = scalar_lea.vmem (!%p349_p9), %s1636_s1, %s1180_s22  ;;  %s1193_s13 = sshll.u32 (!%p349_p9), %s1474_s21, 7 }
  0x16   : > { %v1384_v0 = vmov 2   ;;  %s392_s29 = scalar_select %p391_p10, %s1474_s21, 1  ;;  %v1184_v3 = vld [vmem:[%s1638_s3] ss:$0 sm:$0xff]  ;;  %vm409_vm2 = vcmask 130048   ;;  %v1385_v12 = vmov 3  }
  0x17   : > { %1308 = vset.pattern.permute.xlu0 %v1384_v0  ;;  %1309 = vset.pattern.permute.xlu1 %v1385_v12  ;;  %v408_v16 = vld [vmem:[%s1637_s2 + $0x8] sm:$0xff]  ;;  %v1386_v17 = vmov 0.0   ;;  %v407_v18 = vld [vmem:[%s1637_s2] sm:$0xff]  ;;  %vm1387_vm3 = vmmov 0   ;;  %v1388_v29 = vmov 0   ;;  %v1389_v30 = vmov 1  }
  0x18   : > { %s1179_s30 = sshll.u32 %s392_s29, 3  ;;  %s1178_s15 = sshll.u32 %s392_s29, 2  ;;  %1215 = vmatprep.subr.mxu0 %v1386_v17  ;;  %1219 = vmatprep.mubr.msk.f32.mxu0 %vm1387_vm3, %v1386_v17  ;;  %v403_v20 = vld [vmem:[%s1636_s1 + $0x8] sm:$0xff]  ;;  %v402_v21 = vld [vmem:[%s1636_s1] sm:$0xff]  ;;  %vm705_vm4 = vcmask 64512   ;;  %v1390_v42 = vmov 4  }
  0x19   : > { %s398_s14 = scalar_lea.vmem %s1639_s4, %s1179_s30  ;;  %s394_s24 = scalar_lea.vmem %s1651_s0, %s1178_s15  ;;  %1216 = vmatpush3.msra.mxu0 %v408_v16  ;;  %1222 = vmatprep.subr.mxu1 %v1386_v17  ;;  %v704_v35 = vld [vmem:[%s1641_s6] sm:$0xff]  ;;  %v1391_v43 = vmov 5  }
  0x1a   : > { %v1506_v1 = vld [vmem:[%s398_s14] sm:$0xff]  ;;  %1217 = vmatprep.subr.mxu0 %v1386_v17  ;;  %1223 = vmatpush3.msra.mxu1 %v403_v20  ;;  %s1392_s30 = smov [#allocation2]  }
  0x1b   : > { %583 = vperm.xlu0 %1308, %v1506_v1   ;;  %v400_v2 = vld [vmem:[%s394_s24] sm:$0xf]  ;;  %1218 = vmatpush3.msra.mxu0 %v407_v18  ;;  %s1098_s24 = scalar_lea.hbm %s1646_s11, %s1193_s13  ;;  %s1326_s12 = sshll.u32 %s1392_s30, 4  ;;  %s1327_s12 = int_to_ptr.vmem [resolvable:$false] %s1326_s12 }
  0x1c   : > { %v401_v4 = vunpack.c.l.bf16 %v400_v2  ;;  %1224 = vmatprep.subr.mxu1 %v1386_v17  ;;  %1229 = vmatprep.subr.mxu0 %v1386_v17  ;;  %v703_v36 = vld [vmem:[%s1640_s5] sm:$0xff]  ;;  %s1328_s21 = scalar_lea.vmem %s1327_s12, 256 }
  0x1d   : > { %1226 = vmatprep.mubr.msk.f32.mxu1 %vm1387_vm3, %v1386_v17  ;;  %1225 = vmatpush3.msra.mxu1 %v402_v21  ;;  %v405_v37 = vld [vmem:[%s404_s26] sm:$0xff]  ;;  %s388_s26 = sand.u32 1, %s1374_s18  }
  0x1e   : > { %vm1515_vm0 = vcmp.gt.f32.partialorder %v401_v4, 0.0  ;;  %1220 = vmatmul.mubr.msk.f32.vlgmr.msra.gmra.mxu0 %vm409_vm2, %v401_v4  ;;  %1236 = vmatprep.subr.mxu1 %v1386_v17  ;;  %v927_v40 = vld [vmem:[%s1643_s8] sm:$0xff]  ;;  %s1177_s29 = sshll.u32 %s388_s26, 3  ;;  %s1087_s25 = scalar_lea.sflag [#allocation3], %s388_s26 }
  0x1f   : > { %1310 = vset.pattern.permute.xlu0 %v1385_v12  ;;  %1230 = vmatpush3.msra.mxu0 %v403_v20  ;;  %v1182_v22 = vsel %vm1515_vm0, 1.0, %v1386_v17  ;;  %v852_v55 = vld [vmem:[%s1642_s7] sm:$0xff]  ;;  %s390_s14 = scalar_lea.vmem [#allocation2], %s1177_s29 }
  0x20   : > { %1233 = vmatprep.mubr.msk.f32.mxu0 %vm1387_vm3, %v1386_v17  ;;  %1231 = vmatprep.subr.mxu0 %v1386_v17  ;;  %v1002_v58 = vld [vmem:[%s1644_s9] sm:$0xff]  ;;  %s1100_s15 = sshll.u32 %s390_s14, 4  ;;  %s1101_s15 = int_to_ptr.vmem [resolvable:$true] %s1100_s15 }
  0x21   : > { %1232 = vmatpush3.msra.mxu0 %v402_v21  ;;  %1227 = vmatmul.mubr.msk.f32.vlgmr.msra.gmra.mxu1 %vm409_vm2, %v1182_v22  ;;  %s1322_s0 = scalar_lea.vmem %s1101_s15, 128  ;;  %p1329_p0 = scmp.lt.s32.totalorder %s1101_s15, %s1327_s12 }
  0x22   : > { %1241 = vmatprep.subr.mxu0 %v1386_v17  ;;  %1238 = vmatprep.mubr.msk.f32.mxu1 %vm1387_vm3, %v1386_v17  ;;  %p1323_p11 = scmp.ne.s32.totalorder %s1101_s15, %s1322_s0  ;;  %p1330_p1 = scmp.lt.s32.totalorder %s1328_s21, %s1322_s0 }
  0x23   : > { %1237 = vmatpush3.msra.mxu1 %v704_v35 }
  0x24   : > { %1246 = vmatprep.subr.mxu1 %v1386_v17  ;;  %p1324_p12 = pnand %p1323_p11, %p1491_p5  ;;  %p1331_p2 = por %p1330_p1, %p1329_p0 }
  0x26   : > { %p1325_p13 = pneg %p1324_p12 }
  0x28   : > { %p1332_p3 = pnand %p1331_p2, %p1325_p13 }
  0x96   : > { %v584_v5 = vpop.permute.xlu0 %583 }
  0x97   : > { %v592_v6 = vadd.f32 %v1184_v3, %v584_v5 }
  0x99   : > { %v594_v7 = vmul.f32 0.2, %v592_v6  ;;  %vm593_vm1 = vcmp.ge.f32.partialorder %v592_v6, 0.0 }
  0x9b   : > { %v595_v9 = vsel %vm593_vm1, %v592_v6, %v594_v7 }
  0x9c   : > { %v596_v10 = vsel %vm1515_vm0, %v595_v9, -1e+30 }
  0x9d   : > { %v597_v11 = vsel %vm409_vm2, %v596_v10, -inf }
  0x9e   : > { %598 = vmax.xlane.f32.xlu0 %v597_v11  ;;  %v1191_v11 = vld [vmem:[%s1645_s10] ss:$0 sm:$0xff] }
  0xde   : > { %v479_v31 = vpop.f32.mrf.mxu0 }
  0xe0   : > { %v1221_v32 = vpop.f32.mrf.mxu0 }
  0xe1   : > { %v572_v39 = vpop.f32.mrf.mxu1 }
  0xe3   : > { %v1228_v41 = vpop.f32.mrf.mxu1 }
 0x127   : > { %v599_v13 = vpop.xlane.xlu0 %598 }
 0x128   : > { %v600_v14 = vmax.f32 %v599_v13, %v1506_v1 }
 0x12a   : > { %v609_v15 = vsub.f32 %v1506_v1, %v600_v14  ;;  %603 = vperm.xlu1 %1309, %v600_v14  }
 0x12c   : > { %v610_v19 = vmul.f32 1.442695, %v609_v15 }
 0x12e   : > { %1316 = vpow2.f32 %v610_v19  ;;  %1311 = vset.pattern.permute.xlu1 %v1388_v29 }
 0x13b   : > { %v1317_v23 = vpop.eup %1316 }
 0x13c   : > { %620 = vperm.xlu0 %1310, %v1317_v23  }
 0x1a5   : > { %v604_v24 = vpop.permute.xlu1 %603 }
 0x1a6   : > { %v606_v25 = vsub.f32 %v596_v10, %v604_v24 }
 0x1a8   : > { %v607_v26 = vmul.f32 1.442695, %v606_v25 }
 0x1aa   : > { %1318 = vpow2.f32 %v607_v26 }
 0x1b7   : > { %v1319_v27 = vpop.eup %1318  ;;  %v621_v47 = vpop.permute.xlu0 %620 }
 0x1b8   : > { %1234 = vmatmul.mubr.msk.f32.vlgmr.msra.gmra.mxu0 %vm409_vm2, %v1319_v27  ;;  %v612_v28 = vsel %vm409_vm2, %v1319_v27, 0.0  ;;  %v623_v49 = vmul.f32 %v621_v47, %v405_v37 }
 0x1b9   : > { %613 = vadd.xlane.f32.xlu1 %v612_v28  ;;  %1243 = vmatprep.mubr.msk.f32.mxu0 %vm1387_vm3, %v1386_v17 }
 0x1ba   : > { %1242 = vmatpush3.msra.mxu0 %v703_v36 }
 0x1bb   : > { %1251 = vmatprep.subr.mxu0 %v1386_v17 }
 0x1bc   : > { %1244 = vmatmul.mubr.msk.f32.vlgmr.msra.gmra.mxu0 %vm705_vm4, %v405_v37 }
 0x1bd   : > { %1253 = vmatprep.mubr.msk.f32.mxu0 %vm1387_vm3, %v1386_v17  ;;  %1252 = vmatpush3.msra.mxu0 %v927_v40 }
 0x1ca   : > { %485 = vperm.xlu1 %1311, %v1506_v1  }
 0x1ce   : > { %1312 = vset.pattern.permute.xlu1 %v1389_v30 }
 0x1cf   : > { %490 = vperm.xlu1 %1312, %v1506_v1  }
 0x1d3   : > { %1313 = vset.pattern.permute.xlu1 %v1385_v12 }
 0x242   : > { %v614_v33 = vpop.xlane.xlu1 %613 }
 0x243   : > { %v615_v34 = vadd.f32 %v1317_v23, %v614_v33 }
 0x245   : > { %1320 = vrcp.f32 %v615_v34 }
 0x246   : > { %v486_v46 = vpop.permute.xlu1 %485 }
 0x247   : > { %v488_v52 = vmul.f32 %v486_v46, %v479_v31 }
 0x24a   : > { %v491_v48 = vpop.permute.xlu1 %490 }
 0x24b   : > { %v493_v53 = vmul.f32 %v491_v48, %v405_v37 }
 0x24d   : > { %v494_v56 = vadd.f32 %v493_v53, %v488_v52 }
 0x252   : > { %v1321_v38 = vpop.eup %1320 }
 0x253   : > { %699 = vperm.xlu1 %1313, %v1321_v38  }
 0x257   : > { %1314 = vset.pattern.permute.xlu1 %v1390_v42 }
 0x258   : > { %499 = vperm.xlu1 %1314, %v1506_v1  }
 0x25c   : > { %1315 = vset.pattern.permute.xlu1 %v1391_v43 }
 0x25d   : > { %577 = vperm.xlu1 %1315, %v1506_v1  }
 0x278   : > { %v693_v44 = vpop.f32.mrf.mxu0 }
 0x279   : > { %v694_v50 = vadd.f32 %v693_v44, %v623_v49 }
 0x27a   : > { %v1235_v45 = vpop.f32.mrf.mxu0 }
 0x27c   : > { %v848_v63 = vpop.f32.mrf.mxu0 }
 0x27e   : > { %v1245_v0 = vpop.f32.mrf.mxu0 }
 0x2ce   : > { %v700_v51 = vpop.permute.xlu1 %699 }
 0x2cf   : > { %v702_v54 = vmul.f32 %v700_v51, %v694_v50 }
 0x2d1   : > { %1239 = vmatmul.mubr.msk.f32.vlgmr.msra.gmra.mxu1 %vm705_vm4, %v702_v54 }
 0x2d2   : > { %1247 = vmatpush3.msra.mxu1 %v852_v55  ;;  %1248 = vmatprep.mubr.msk.f32.mxu1 %vm1387_vm3, %v1386_v17 }
 0x2d3   : > { %v500_v57 = vpop.permute.xlu1 %499  ;;  %1256 = vmatprep.subr.mxu1 %v1386_v17 }
 0x2d4   : > { %v502_v59 = vmul.f32 %v500_v57, %v405_v37 }
 0x2d5   : > { %1249 = vmatmul.mubr.msk.f32.vlgmr.msra.gmra.mxu1 %vm705_vm4, %v494_v56 }
 0x2d6   : > { %v573_v60 = vadd.f32 %v572_v39, %v502_v59  ;;  %1257 = vmatpush3.msra.mxu1 %v1002_v58  ;;  %1258 = vmatprep.mubr.msk.f32.mxu1 %vm1387_vm3, %v1386_v17 }
 0x2d8   : > { %v578_v61 = vpop.permute.xlu1 %577  ;;  %1254 = vmatmul.mubr.msk.f32.vlgmr.msra.gmra.mxu0 %vm705_vm4, %v573_v60 }
 0x2d9   : > { %v580_v62 = vmul.f32 %v578_v61, %v573_v60 }
 0x2db   : > { %1259 = vmatmul.mubr.msk.f32.vlgmr.msra.gmra.mxu1 %vm705_vm4, %v580_v62 }
 0x391   : > { %v775_v1 = vpop.f32.mrf.mxu1 }
 0x392   : > { %v849_v3 = vadd.f32 %v848_v63, %v775_v1 }
 0x393   : > { %v1240_v2 = vpop.f32.mrf.mxu1 }
 0x395   : > { %v922_v4 = vpop.f32.mrf.mxu1 }
 0x396   : > { %v926_v5 = vadd.f32 %v922_v4, %v849_v3 }
 0x397   : > { %v1250_v6 = vpop.f32.mrf.mxu1 }
 0x398   : > { %v997_v7 = vpop.f32.mrf.mxu0 }
 0x399   : > { %v1001_v8 = vadd.f32 %v997_v7, %v926_v5 }
 0x39a   : > { %v1255_v9 = vpop.f32.mrf.mxu0 }
 0x39b   : > { %v1072_v10 = vpop.f32.mrf.mxu1 }
 0x39c   : > { %v1076_v12 = vadd.f32 %v1072_v10, %v1001_v8 }
 0x39d   : > { %v1260_v13 = vpop.f32.mrf.mxu1 }
 0x39e   : > { %v1084_v14 = vadd.f32 %v1191_v11, %v1076_v12 }
 0x3a0   : > { %1085 = vst [vmem:[%s390_s14] sm:$0xff] %v1084_v14 }
 0x3a1   : > { %1335 = shalt.err (!%p1332_p3)
}
 0x3a2   : > { %s1336_s29 = scalar_lea.hbm %s1098_s24, 128  ;;  %s1340_s14 = scalar_lea.hbm %s1646_s11, 256 }
 0x3a3   : > { %p1337_p4 = scmp.ne.s32.totalorder %s1098_s24, %s1336_s29  ;;  %p1341_p9 = scmp.lt.s32.totalorder %s1098_s24, %s1646_s11 }
 0x3a4   : > { %p1342_p10 = scmp.lt.s32.totalorder %s1340_s14, %s1336_s29 }
 0x3a5   : > { %p1338_p7 = pnand %p1337_p4, %p1491_p5 }
 0x3a6   : > { %p1343_p11 = por %p1342_p10, %p1341_p9 }
 0x3a7   : > { %p1339_p8 = pneg %p1338_p7 }
 0x3a9   : > { %p1344_p12 = pnand %p1343_p11, %p1339_p8 }
 0x3ab   : > { %1347 = shalt.err (!%p1344_p12)
}
 0x3ac   : > { %1261 = dma.vmem_to_hbm [thread:$0]  (%p1491_p5), %s1101_s15, 128, %s1098_s24, %s1087_s25  }
 0x3ad PF: > { %p1267_p13 = scmp.ge.s32.totalorder %s1382_s20, 2  ;;  %s1112_s0 = sand.u32 1, %s1370_s17  }
 0x3ae   : > { %s1113_s30 = scalar_lea.sflag [#allocation3], %s1112_s0 }
 0x3af   : > { %p1264_p0 = pnand %p1267_p13, %p1495_p6 }
 0x3b1   : > { %p1265_p1 = pneg %p1264_p0 }
 0x3b3   : > { %1365 = dma.done.wait (%p1265_p1), %s1113_s30, 128  }
 0x3b4   : > { %1367 = vsyncadd (%p1265_p1), %s1113_s30, 4294967168  ;;  %s1654_s12 = sld [smem:[#allocation5_spill]]  ;;  %p21_p2 = scmp.ge.s32.totalorder %s1478_s23, 4  }
 0x3b5   : > { %s1655_s17 = smov %s1374_s18  ;;  %s1656_s18 = smov %s1378_s19 }
 0x3b6   : > { %s1658_s20 = smov %s1478_s23  ;;  %23 = sbr.rel (!%p21_p2) target bundleno = 5 (0x5), region = 103 }
 0x3ba   : > { %s1657_s19 = smov %s1654_s12 }
 0x3bb   :  { %1118 = vsyncpa [#allocation3], 1 }
 0x3bc   :  { %1120 = vsyncpa [#allocation3 + $0x1], 1 }

</bundles_post_ra>
